<compile_context>
chip_gen: v7x
topology: tpu7x:2x2x1
jax: 0.10.0
libtpu: 0.0.40
codegen_flags: <defaults>
</compile_context>

<pallas_src>
import functools

import jax
import jax.numpy as jnp
from jax.experimental import pallas as pl
from jax.experimental.pallas import tpu as pltpu


def _decomposed_attention_kernel(q_ref, k_ref, v_ref, o_ref, *, inv_scale):
    f32 = jnp.float32
    q = q_ref[...]                     # (Bb, S, H)
    k = k_ref[...]                     # (Bb, S, H)
    v = v_ref[...]                     # (Bb, S, H)

    # Small (S,H) -> (H,S) transposes; these only feed the two (H,H) Gram
    # products and are much cheaper than the (S,S)/(H,S) transposes of the
    # naive formulation.
    qt = jnp.swapaxes(q, 1, 2)         # (Bb, H, S)
    kt = jnp.swapaxes(k, 1, 2)         # (Bb, H, S)

    # A = Q^T Q, G = K^T V : (Bb, H, H) — all MXU work, f32 accumulation.
    a = jnp.einsum("bhs,bsg->bhg", qt, q, preferred_element_type=f32)
    g = jnp.einsum("bhs,bsg->bhg", kt, v, preferred_element_type=f32)

    # M = (A @ G) / h : fold the scale into the tiny (H,H) tile instead of an
    # (S,S) elementwise divide (VPU filler in the old kernel).
    m = jnp.einsum("bhg,bgf->bhf", a, g, preferred_element_type=f32) * inv_scale

    # T = Q @ M : (Bb, S, H)
    t = jnp.einsum("bsh,bhf->bsf", q, m, preferred_element_type=f32)

    # out = T @ Q^T : contracts the H axis of BOTH operands (rhs-transposed MXU
    # feed), so Q^T is never materialized for the big matmul.
    out = jnp.einsum("bsf,btf->bst", t, q, preferred_element_type=f32)  # (Bb, S, S)

    o_ref[...] = out.astype(o_ref.dtype)


def _pick_batch_block(B, S, H, itemsize=4, budget_bytes=16 * 1024 * 1024):
    """Largest divisor of B whose double-buffered I/O tiles fit the VMEM budget."""
    per_elem = 2 * itemsize * (3 * S * H + S * S)  # 2x for double buffering
    bb = max(1, min(B, budget_bytes // max(per_elem, 1)))
    while B % bb:
        bb -= 1
    return bb


def decomposed_attention(X, Q, K, V, h):
    """Pallas implementation of DecomposedAttention.forward.

    X is accepted for signature fidelity but (like the PyTorch module) unused.
    Q, K, V: [B, S, H] float32. Returns [B, S, S] float32.
    """
    del X  # overwritten by Q^T in the reference module
    B, S, H = Q.shape
    assert K.shape == (B, S, H) and V.shape == (B, S, H)

    Bb = _pick_batch_block(B, S, H)
    grid = (B // Bb,)

    kernel = functools.partial(_decomposed_attention_kernel, inv_scale=1.0 / float(h))

    return pl.pallas_call(
        kernel,
        out_shape=jax.ShapeDtypeStruct((B, S, S), jnp.float32),
        grid_spec=pltpu.PrefetchScalarGridSpec(
            num_scalar_prefetch=0,
            grid=grid,
            in_specs=[
                pl.BlockSpec((Bb, S, H), lambda b: (b, 0, 0)),
                pl.BlockSpec((Bb, S, H), lambda b: (b, 0, 0)),
                pl.BlockSpec((Bb, S, H), lambda b: (b, 0, 0)),
            ],
            out_specs=pl.BlockSpec((Bb, S, S), lambda b: (b, 0, 0)),
        ),
        compiler_params=pltpu.CompilerParams(
            dimension_semantics=("parallel",),
            vmem_limit_bytes=64 * 1024 * 1024,
        ),
    )(Q, K, V)


def _reference(X, Q, K, V, h):
    # Pure-JAX mirror of the PyTorch forward for correctness checking.
    Xt = jnp.swapaxes(Q, -2, -1)
    QX = jnp.matmul(Q, Xt)
    KXT = jnp.swapaxes(jnp.matmul(K, Xt), -2, -1)
    VX = jnp.matmul(V, Xt) / h
    return jnp.matmul(QX, jnp.matmul(KXT, VX))


if __name__ == "__main__":
    B, S, H = 2, 8, 32  # batch, sequence, hidden; scale = H (module's `h`)

    key = jax.random.PRNGKey(0)
    kx, kq, kk, kv = jax.random.split(key, 4)
    X = jax.random.normal(kx, (B, S, H), dtype=jnp.float32)  # ignored by forward
    Q = jax.random.normal(kq, (B, S, H), dtype=jnp.float32)
    K = jax.random.normal(kk, (B, S, H), dtype=jnp.float32)
    V = jax.random.normal(kv, (B, S, H), dtype=jnp.float32)

    out = decomposed_attention(X, Q, K, V, H)
    out = jax.block_until_ready(out)

    ref = jax.block_until_ready(_reference(X, Q, K, V, H))
    assert out.shape == (B, S, S)
    # Tolerance slightly looser than before: the associativity rewrite changes
    # the floating-point accumulation order (values are O(100) here).
    assert jnp.allclose(out, ref, atol=2e-3, rtol=2e-3), "mismatch vs reference"

    print("KERNEL_OK")
</pallas_src>

<mosaic_0001>
module attributes {stable_mosaic.version = 11 : i64} {
  func.func @_decomposed_attention_kernel(%arg0: i32, %arg1: memref<2x8x32xf32, #tpu.memory_space<vmem>>, %arg2: memref<2x8x32xf32, #tpu.memory_space<vmem>>, %arg3: memref<2x8x32xf32, #tpu.memory_space<vmem>>, %arg4: memref<2x8x8xf32, #tpu.memory_space<vmem>>) attributes {dimension_semantics = [#tpu.dimension_semantics<parallel>], iteration_bounds = array<i64: 1>, scalar_prefetch = 0 : i64, scratch_operands = 0 : i64, tpu.core_type = #tpu.core_type<tc>, window_params = [{transform_indices = @transform_0, window_bounds = array<i64: 2, 8, 32>}, {transform_indices = @transform_1, window_bounds = array<i64: 2, 8, 32>}, {transform_indices = @transform_2, window_bounds = array<i64: 2, 8, 32>}, {transform_indices = @transform_3, window_bounds = array<i64: 2, 8, 8>}]} {
    %c0 = arith.constant 0 : index
    %c0_0 = arith.constant 0 : index
    %c0_1 = arith.constant 0 : index
    %0 = vector.load %arg1[%c0, %c0_0, %c0_1] : memref<2x8x32xf32, #tpu.memory_space<vmem>>, vector<2x8x32xf32>
    %c0_2 = arith.constant 0 : index
    %c0_3 = arith.constant 0 : index
    %c0_4 = arith.constant 0 : index
    %1 = vector.load %arg2[%c0_2, %c0_3, %c0_4] : memref<2x8x32xf32, #tpu.memory_space<vmem>>, vector<2x8x32xf32>
    %c0_5 = arith.constant 0 : index
    %c0_6 = arith.constant 0 : index
    %c0_7 = arith.constant 0 : index
    %2 = vector.load %arg3[%c0_5, %c0_6, %c0_7] : memref<2x8x32xf32, #tpu.memory_space<vmem>>, vector<2x8x32xf32>
    %3 = tpu.transpose %0, [0, 2, 1] : vector<2x8x32xf32> -> vector<2x32x8xf32>
    %4 = tpu.transpose %1, [0, 2, 1] : vector<2x8x32xf32> -> vector<2x32x8xf32>
    "tpu.trace_start"() <{level = 10 : i32, message = "bhs,bsg->bhg"}> : () -> ()
    %cst = arith.constant dense<0.000000e+00> : vector<2x32x32xf32>
    %5 = tpu.matmul %3, %0, %cst {dimension_numbers = #tpu.dot_dimension_numbers<[2], [1], [1], [2], [0, 0, 0, 1, 1, 2], [0], [0]>} : vector<2x32x8xf32>, vector<2x8x32xf32>, vector<2x32x32xf32> -> vector<2x32x32xf32>
    %cst_8 = arith.constant dense<0.000000e+00> : vector<2x32x32xf32>
    %6 = tpu.matmul %4, %2, %cst_8 {dimension_numbers = #tpu.dot_dimension_numbers<[2], [1], [1], [2], [0, 0, 0, 1, 1, 2], [0], [0]>} : vector<2x32x8xf32>, vector<2x8x32xf32>, vector<2x32x32xf32> -> vector<2x32x32xf32>
    "tpu.trace_stop"() : () -> ()
    "tpu.trace_start"() <{level = 10 : i32, message = "bhg,bgf->bhf"}> : () -> ()
    %cst_9 = arith.constant dense<0.000000e+00> : vector<2x32x32xf32>
    %7 = tpu.matmul %5, %6, %cst_9 {dimension_numbers = #tpu.dot_dimension_numbers<[2], [1], [1], [2], [0, 0, 0, 1, 1, 2], [0], [0]>} : vector<2x32x32xf32>, vector<2x32x32xf32>, vector<2x32x32xf32> -> vector<2x32x32xf32>
    "tpu.trace_stop"() : () -> ()
    %cst_10 = arith.constant 3.125000e-02 : f32
    %8 = vector.broadcast %cst_10 : f32 to vector<2x32x32xf32>
    %9 = arith.mulf %7, %8 : vector<2x32x32xf32>
    "tpu.trace_start"() <{level = 10 : i32, message = "bsh,bhf->bsf"}> : () -> ()
    %cst_11 = arith.constant dense<0.000000e+00> : vector<2x8x32xf32>
    %10 = tpu.matmul %0, %9, %cst_11 {dimension_numbers = #tpu.dot_dimension_numbers<[2], [1], [1], [2], [0, 0, 0, 1, 1, 2], [0], [0]>} : vector<2x8x32xf32>, vector<2x32x32xf32>, vector<2x8x32xf32> -> vector<2x8x32xf32>
    "tpu.trace_stop"() : () -> ()
    "tpu.trace_start"() <{level = 10 : i32, message = "bsf,btf->bst"}> : () -> ()
    %cst_12 = arith.constant dense<0.000000e+00> : vector<2x8x8xf32>
    %11 = tpu.matmul %10, %0, %cst_12 {dimension_numbers = #tpu.dot_dimension_numbers<[2], [2], [1], [1], [0, 0, 0, 1, 1, 1], [0], [0]>} : vector<2x8x32xf32>, vector<2x8x32xf32>, vector<2x8x8xf32> -> vector<2x8x8xf32>
    "tpu.trace_stop"() : () -> ()
    %c0_13 = arith.constant 0 : index
    %c0_14 = arith.constant 0 : index
    %c0_15 = arith.constant 0 : index
    %12 = vector.load %arg4[%c0_13, %c0_14, %c0_15] : memref<2x8x8xf32, #tpu.memory_space<vmem>>, vector<2x8x8xf32>
    tpu.vector_store %arg4[%c0_13, %c0_14, %c0_15], %11 {strides = array<i32>} : memref<2x8x8xf32, #tpu.memory_space<vmem>>, vector<2x8x8xf32>,
    return
  }
  func.func @transform_0(%arg0: i32) -> (i32, i32, i32) {
    %c0_i32 = arith.constant 0 : i32
    %c0_i32_0 = arith.constant 0 : i32
    %c0_i32_1 = arith.constant 0 : i32
    return %arg0, %c0_i32, %c0_i32_0 : i32, i32, i32
  }
  func.func @transform_1(%arg0: i32) -> (i32, i32, i32) {
    %c0_i32 = arith.constant 0 : i32
    %c0_i32_0 = arith.constant 0 : i32
    %c0_i32_1 = arith.constant 0 : i32
    return %arg0, %c0_i32, %c0_i32_0 : i32, i32, i32
  }
  func.func @transform_2(%arg0: i32) -> (i32, i32, i32) {
    %c0_i32 = arith.constant 0 : i32
    %c0_i32_0 = arith.constant 0 : i32
    %c0_i32_1 = arith.constant 0 : i32
    return %arg0, %c0_i32, %c0_i32_0 : i32, i32, i32
  }
  func.func @transform_3(%arg0: i32) -> (i32, i32, i32) {
    %c0_i32 = arith.constant 0 : i32
    %c0_i32_0 = arith.constant 0 : i32
    %c0_i32_1 = arith.constant 0 : i32
    return %arg0, %c0_i32, %c0_i32_0 : i32, i32, i32
  }
}

</mosaic_0001>

<bundles_post_ra>
// kernel: tpu_custom_call.1
= control target key start
LH: loop header
LB: loop body
LE: loop exit
PB: predicated region body
PF: predicated region fallthrough
CT: control target
= control target key end

     0   :  { %8 = vsyncpa [#allocation3], 0  ;;  %s1543_s0 = inlined_call_operand.hbm [shape: f32[2,8,32], index: 0, kind: input, shape index: {}]   ;;  %s1544_s1 = inlined_call_operand.hbm [shape: f32[2,8,32], index: 1, kind: input, shape index: {}]   ;;  %s1545_s2 = inlined_call_operand.hbm [shape: f32[2,8,32], index: 2, kind: input, shape index: {}]   ;;  %s1546_s3 = inlined_call_operand.hbm [shape: f32[2,8,8], index: 3, kind: output, shape index: {}]  }
   0x1   :  { %9 = vsyncpa [#allocation6], 0 }
   0x2   :  { %10 = vsyncpa [#allocation4], 0  ;;  %s1397_s12 = smov [#allocation5]   ;;  %s1398_s14 = smov [#allocation2]  }
   0x3   :  { %s28_s13 = sshll.u32 %s1397_s12, 4  ;;  %s16_s15 = sshll.u32 %s1398_s14, 4  ;;  %s29_s13 = int_to_ptr.vmem [resolvable:$true] %s28_s13  ;;  %s1426_s15 = int_to_ptr.vmem [resolvable:$true] %s16_s15 }
   0x4   :  { %s1303_s18 = scalar_lea.hbm %s1544_s1, 256 }
   0x5   :  { %p1304_p0 = scmp.ne.s32.totalorder %s1544_s1, %s1303_s18  ;;  %p1307_p1 = scmp.lt.u32.totalorder %s1303_s18, %s1544_s1 }
   0x7   :  { %p1309_p2 = pnand %p1307_p1, %p1304_p0 }
   0x9   :  { %1312 = shalt.err (!%p1309_p2)
}
   0xa   :  { %s1313_s23 = scalar_lea.vmem %s29_s13, 256  ;;  %p1318_p4 = scmp.lt.s32.totalorder %s29_s13, %s29_s13 }
   0xb   :  { %p1314_p3 = scmp.ne.s32.totalorder %s29_s13, %s1313_s23  ;;  %p1319_p5 = scmp.lt.s32.totalorder %s1313_s23, %s1313_s23 }
   0xd   :  { %p1320_p6 = por %p1319_p5, %p1318_p4 }
   0xf   :  { %p1321_p7 = pnand %p1320_p6, %p1314_p3 }
  0x11   :  { %1324 = shalt.err (!%p1321_p7)
}
  0x12   :  { %s1399_s24 = smov 128   ;;  %s1400_s25 = smov 8  }
  0x13   :  { %34 = dma.hbm_to_vmem [thread:$0]  %s1544_s1, 256, %s29_s13, [#allocation6], %s1399_s24, %s1399_s24, %s1400_s25  }
  0x14   :  { %s1325_s30 = scalar_lea.hbm %s1543_s0, 256 }
  0x15   :  { %p1326_p8 = scmp.ne.s32.totalorder %s1543_s0, %s1325_s30  ;;  %p1329_p9 = scmp.lt.u32.totalorder %s1325_s30, %s1543_s0 }
  0x17   :  { %p1331_p10 = pnand %p1329_p9, %p1326_p8 }
  0x19   :  { %1334 = shalt.err (!%p1331_p10)
}
  0x1a   :  { %s1335_s8 = scalar_lea.vmem %s1426_s15, 256  ;;  %p1340_p12 = scmp.lt.s32.totalorder %s1426_s15, %s1426_s15 }
  0x1b   :  { %p1336_p11 = scmp.ne.s32.totalorder %s1426_s15, %s1335_s8  ;;  %p1341_p13 = scmp.lt.s32.totalorder %s1335_s8, %s1335_s8 }
  0x1d   :  { %p1342_p0 = por %p1341_p13, %p1340_p12 }
  0x1f   :  { %p1343_p1 = pnand %p1342_p0, %p1336_p11 }
  0x21   :  { %1346 = shalt.err (!%p1343_p1)
}
  0x22   :  { %22 = dma.hbm_to_vmem [thread:$0]  %s1543_s0, 256, %s1426_s15, [#allocation3], %s1399_s24, %s1399_s24, %s1400_s25  }
  0x23   :  { %s1401_s10 = smov [#allocation7]   ;;  %s1347_s14 = scalar_lea.hbm %s1545_s2, 256 }
  0x24   :  { %s40_s11 = sshll.u32 %s1401_s10, 4  ;;  %p1348_p2 = scmp.ne.s32.totalorder %s1545_s2, %s1347_s14  ;;  %s41_s11 = int_to_ptr.vmem [resolvable:$true] %s40_s11 }
  0x25   :  { %p1351_p3 = scmp.lt.u32.totalorder %s1347_s14, %s1545_s2 }
  0x27   :  { %p1353_p4 = pnand %p1351_p3, %p1348_p2 }
  0x29   :  { %1356 = shalt.err (!%p1353_p4)
}
  0x2a   :  { %s1357_s20 = scalar_lea.vmem %s41_s11, 256  ;;  %p1362_p6 = scmp.lt.s32.totalorder %s41_s11, %s41_s11 }
  0x2b   :  { %p1358_p5 = scmp.ne.s32.totalorder %s41_s11, %s1357_s20  ;;  %p1363_p7 = scmp.lt.s32.totalorder %s1357_s20, %s1357_s20 }
  0x2d   :  { %p1364_p8 = por %p1363_p7, %p1362_p6 }
  0x2f   :  { %p1365_p9 = pnand %p1364_p8, %p1358_p5 }
  0x31   :  { %1368 = shalt.err (!%p1365_p9)
}
  0x32   :  { %46 = dma.hbm_to_vmem [thread:$0]  %s1545_s2, 256, %s41_s11, [#allocation6], %s1399_s24, %s1399_s24, %s1400_s25  }
  0x33   :  { %1391 = dma.done.wait [#allocation3], 256  }
  0x34   :  { %1392 = vsyncadd [#allocation3], 4294967040 }
  0x35   :  { %1393 = dma.done.wait [#allocation6], 512  }
  0x36   :  { %1394 = vsyncadd [#allocation6], 4294966784  ;;  %v1478_v0 = vld [vmem:[#allocation2] sm:$0xff]  ;;  %v58_v1 = vld [vmem:[#allocation5] sm:$0xff]  ;;  %vm190_vm0 = vcmask 64512   ;;  %vm579_vm1 = vcmask 261120  }
  0x37   :  { %62 = vxpose.xlu0.b32.start.end [1/1] (short) (narrow) %v1478_v0, 32  ;;  %126 = vxpose.xlu1.b32.start.end [1/1] (short) (narrow) %v58_v1, 32  ;;  %v1481_v2 = vld [vmem:[#allocation2 + $0x8] sm:$0xff]  ;;  %v59_v3 = vld [vmem:[#allocation5 + $0x8] sm:$0xff]  ;;  %v60_v4 = vld [vmem:[#allocation7] sm:$0xff]  ;;  %v1402_v42 = vmov 0.0|0.0  }
  0x38   :  { %1174 = vmatprep.subr.mxu0 %v1478_v0  ;;  %1182 = vmatprep.subr.mxu1 %v1481_v2  ;;  %v61_v5 = vld [vmem:[#allocation7 + $0x8] sm:$0xff]  ;;  %vm1403_vm2 = vmmov 0   ;;  %v1404_v43 = vmov 0.0   ;;  %s1405_s2 = smov [#allocation8]  }
  0x39   :  { %1175 = vmatpush3.msra.mxu0 %v1478_v0  ;;  %1183 = vmatpush3.msra.mxu1 %v1481_v2  ;;  %s1081_s21 = sshll.u32 %s1405_s2, 4  ;;  %s1082_s21 = int_to_ptr.vmem [resolvable:$true] %s1081_s21 }
  0x3a   :  { %1190 = vmatprep.subr.mxu0 %v60_v4  ;;  %1198 = vmatprep.subr.mxu1 %v61_v5  ;;  %s1369_s22 = scalar_lea.vmem %s1082_s21, 256  ;;  %p1374_p11 = scmp.lt.s32.totalorder %s1082_s21, %s1082_s21 }
  0x3b   :  { %p1370_p10 = scmp.ne.s32.totalorder %s1082_s21, %s1369_s22  ;;  %p1375_p12 = scmp.lt.s32.totalorder %s1369_s22, %s1369_s22 }
  0x3d   :  { %p1376_p13 = por %p1375_p12, %p1374_p11 }
  0x3f   :  { %p1377_p0 = pnand %p1376_p13, %p1370_p10 }
  0x44   :  { %94 = vxpose.xlu0.b32.start.end [1/1] (short) (narrow) %v1481_v2, 32  ;;  %158 = vxpose.xlu1.b32.start.end [1/1] (short) (narrow) %v59_v3, 32 }
  0xb7   :  { %v78_v6 = vpop.trf.xlu0  ;;  %v142_v7 = vpop.trf.xlu1 }
  0xb8   :  { %1176 = vmatprep.mubr.msk.f32.mxu0 %vm190_vm0, %v78_v6 }
  0xbb   :  { %v79_v8 = vpop.trf.xlu0  ;;  %v143_v9 = vpop.trf.xlu1 }
  0xbc   :  { %1177 = vmatmul.mubr.msk.f32.vlgmr.msra.gmra.mrb[0].mxu0 %vm190_vm0, %v79_v8 }
  0xbd   :  { %1191 = vmatpush3.msra.mxu0 %v60_v4 }
  0xbf   :  { %v80_v10 = vpop.trf.xlu0  ;;  %v144_v11 = vpop.trf.xlu1 }
  0xc0   :  { %1179 = vmatprep.mubr.msk.f32.mxu0 %vm190_vm0, %v80_v10 }
  0xc3   :  { %v81_v12 = vpop.trf.xlu0  ;;  %v145_v13 = vpop.trf.xlu1 }
  0xc4   :  { %1180 = vmatmul.mubr.msk.f32.gmra.mrb[2].mxu0 %vm190_vm0, %v81_v12 }
  0xc5   :  { %1192 = vmatprep.mubr.msk.f32.mxu0 %vm190_vm0, %v142_v7 }
  0xc7   :  { %v110_v14 = vpop.trf.xlu0  ;;  %v174_v15 = vpop.trf.xlu1 }
  0xc8   :  { %1184 = vmatprep.mubr.msk.f32.mxu1 %vm190_vm0, %v110_v14  ;;  %1193 = vmatmul.mubr.msk.f32.vlgmr.msra.gmra.mrb[4].mxu0 %vm190_vm0, %v143_v9 }
  0xc9   :  { %1195 = vmatprep.mubr.msk.f32.mxu0 %vm190_vm0, %v144_v11 }
  0xcb   :  { %v111_v16 = vpop.trf.xlu0  ;;  %v175_v17 = vpop.trf.xlu1 }
  0xcc   :  { %1185 = vmatmul.mubr.msk.f32.vlgmr.msra.gmra.mrb[0].mxu1 %vm190_vm0, %v111_v16  ;;  %1196 = vmatmul.mubr.msk.f32.gmra.mrb[6].mxu0 %vm190_vm0, %v145_v13 }
  0xcd   :  { %1199 = vmatpush3.msra.mxu1 %v61_v5 }
  0xcf   :  { %v112_v18 = vpop.trf.xlu0  ;;  %v176_v20 = vpop.trf.xlu1 }
  0xd0   :  { %1187 = vmatprep.mubr.msk.f32.mxu1 %vm190_vm0, %v112_v18 }
  0xd3   :  { %v113_v19 = vpop.trf.xlu0  ;;  %v177_v21 = vpop.trf.xlu1 }
  0xd4   :  { %1188 = vmatmul.mubr.msk.f32.gmra.mrb[2].mxu1 %vm190_vm0, %v113_v19 }
  0xd5   :  { %1200 = vmatprep.mubr.msk.f32.mxu1 %vm190_vm0, %v174_v15 }
  0xd8   :  { %1201 = vmatmul.mubr.msk.f32.vlgmr.msra.gmra.mrb[4].mxu1 %vm190_vm0, %v175_v17 }
  0xd9   :  { %1203 = vmatprep.mubr.msk.f32.mxu1 %vm190_vm0, %v176_v20 }
  0xdc   :  { %1204 = vmatmul.mubr.msk.f32.gmra.mrb[6].mxu1 %vm190_vm0, %v177_v21 }
 0x18f   :  { %v1178_v22 = vpop.f32.mrb[0].mxu0 }
 0x190   :  { %v269_v23 = vpop.f32.mrb[1].mxu0 }
 0x191   :  { %1214 = vmatprep.mubr.msk.f32.mxu0 %vm579_vm1, %v269_v23 }
 0x197   :  { %v1181_v24 = vpop.f32.mrb[2].mxu0 }
 0x198   :  { %v279_v25 = vpop.f32.mrb[3].mxu0 }
 0x19b   :  { %v1194_v26 = vpop.f32.mrb[4].mxu0 }
 0x19c   :  { %v463_v27 = vpop.f32.mrb[5].mxu0 }
 0x19d   :  { %v1266_v28 = vpack.c.bf16 %v1194_v26, %v463_v27 }
 0x19f   :  { %v1186_v29 = vpop.f32.mrb[0].mxu1  ;;  %v1197_v30 = vpop.f32.mrb[6].mxu0  ;;  %1267 = vmatprep.subr.bf16.mxu0 %v1266_v28 }
 0x1a0   :  { %v366_v31 = vpop.f32.mrb[1].mxu1  ;;  %v473_v32 = vpop.f32.mrb[7].mxu0  ;;  %1269 = vmatpush3.bf16.msra.mxu0 %v1266_v28 }
 0x1a1   :  { %v1270_v33 = vpack.c.bf16 %v1197_v30, %v473_v32  ;;  %1228 = vmatprep.mubr.msk.f32.mxu1 %vm579_vm1, %v366_v31 }
 0x1a3   :  { %1271 = vmatprep.subr.bf16.mxu0 %v1270_v33 }
 0x1a4   :  { %1273 = vmatpush3.bf16.msra.mxu0 %v1270_v33 }
 0x1a5   :  { %1282 = vmatprep.subr.bf16.mxu0 %v1402_v42 }
 0x1a7   :  { %v1189_v34 = vpop.f32.mrb[2].mxu1  ;;  %1215 = vmatmul.mubr.msk.f32.vlgmr.msra.gmra.mrb[8].mxu0 %vm579_vm1, %v1178_v22 }
 0x1a8   :  { %v376_v35 = vpop.f32.mrb[3].mxu1  ;;  %1217 = vmatprep.mubr.msk.f32.mxu0 %vm579_vm1, %v279_v25 }
 0x1ab   :  { %v1202_v36 = vpop.f32.mrb[4].mxu1  ;;  %1218 = vmatmul.mubr.msk.f32.gmra.mrb[10].mxu0 %vm579_vm1, %v1181_v24 }
 0x1ac   :  { %v560_v37 = vpop.f32.mrb[5].mxu1  ;;  %1242 = vmatprep.mubr.msk.f32.mxu0 %vm1403_vm2, %v1404_v43 }
 0x1ad   :  { %v1274_v38 = vpack.c.bf16 %v1202_v36, %v560_v37 }
 0x1af   :  { %v1205_v39 = vpop.f32.mrb[6].mxu1  ;;  %1275 = vmatprep.subr.bf16.mxu1 %v1274_v38 }
 0x1b0   :  { %v570_v40 = vpop.f32.mrb[7].mxu1  ;;  %1277 = vmatpush3.bf16.msra.mxu1 %v1274_v38 }
 0x1b1   :  { %v1278_v41 = vpack.c.bf16 %v1205_v39, %v570_v40 }
 0x1b3   :  { %1279 = vmatprep.subr.bf16.mxu1 %v1278_v41 }
 0x1b4   :  { %1281 = vmatpush3.bf16.msra.mxu1 %v1278_v41 }
 0x1b5   :  { %1288 = vmatprep.subr.bf16.mxu1 %v1402_v42 }
 0x1b7   :  { %1229 = vmatmul.mubr.msk.f32.vlgmr.msra.gmra.mrb[8].mxu1 %vm579_vm1, %v1186_v29 }
 0x1b8   :  { %1231 = vmatprep.mubr.msk.f32.mxu1 %vm579_vm1, %v376_v35 }
 0x1bb   :  { %1232 = vmatmul.mubr.msk.f32.gmra.mrb[10].mxu1 %vm579_vm1, %v1189_v34 }
 0x1bc   :  { %1253 = vmatprep.mubr.msk.f32.mxu1 %vm1403_vm2, %v1404_v43 }
 0x27a   :  { %v1216_v44 = vpop.f32.mrb[8].mxu0 }
 0x27b   :  { %v775_v45 = vmul.f32 0.03125, %v1216_v44  ;;  %v658_v46 = vpop.f32.mrb[9].mxu0 }
 0x27c   :  { %v774_v47 = vmul.f32 0.03125, %v658_v46 }
 0x27e   :  { %v1283_v48 = vpack.c.bf16 %v775_v45, %v774_v47  ;;  %v1219_v49 = vpop.f32.mrb[10].mxu0 }
 0x27f   :  { %v777_v50 = vmul.f32 0.03125, %v1219_v49  ;;  %v668_v51 = vpop.f32.mrb[11].mxu0 }
 0x280   :  { %v776_v52 = vmul.f32 0.03125, %v668_v51  ;;  %1284 = vmatpush3.bf16.msra.mxu0 %v1283_v48 }
 0x281   :  { %1285 = vmatprep.subr.bf16.mxu0 %v1402_v42 }
 0x282   :  { %v1286_v53 = vpack.c.bf16 %v777_v50, %v776_v52 }
 0x284   :  { %1287 = vmatpush3.bf16.msra.mxu0 %v1286_v53 }
 0x285   :  { %1256 = vmatprep.subr.mxu0 %v1404_v43 }
 0x287   :  { %1243 = vmatmul.mubr.msk.f32.vlgmr.msra.gmra.mrb[12].mxu0 %vm579_vm1, %v1478_v0 }
 0x288   :  { %1258 = vmatprep.mubr.msk.f32.mxu0 %vm1403_vm2, %v1404_v43 }
 0x28a   :  { %v1230_v54 = vpop.f32.mrb[8].mxu1 }
 0x28b   :  { %v779_v55 = vmul.f32 0.03125, %v1230_v54  ;;  %v755_v56 = vpop.f32.mrb[9].mxu1 }
 0x28c   :  { %v778_v57 = vmul.f32 0.03125, %v755_v56 }
 0x28d   :  { %1257 = vmatpush3.xpose.msk.msra.mxu0 %vm579_vm1, %v1478_v0 }
 0x28e   :  { %v1289_v58 = vpack.c.bf16 %v779_v55, %v778_v57  ;;  %v1233_v59 = vpop.f32.mrb[10].mxu1 }
 0x28f   :  { %v781_v60 = vmul.f32 0.03125, %v1233_v59  ;;  %v765_v61 = vpop.f32.mrb[11].mxu1 }
 0x290   :  { %v780_v62 = vmul.f32 0.03125, %v765_v61  ;;  %1290 = vmatpush3.bf16.msra.mxu1 %v1289_v58 }
 0x291   :  { %1291 = vmatprep.subr.bf16.mxu1 %v1402_v42 }
 0x292   :  { %v1292_v63 = vpack.c.bf16 %v781_v60, %v780_v62 }
 0x294   :  { %1293 = vmatpush3.bf16.msra.mxu1 %v1292_v63 }
 0x295   :  { %1261 = vmatprep.subr.mxu1 %v1404_v43 }
 0x297   :  { %1254 = vmatmul.mubr.msk.f32.vlgmr.msra.gmra.mrb[12].mxu1 %vm579_vm1, %v1481_v2 }
 0x298   :  { %1263 = vmatprep.mubr.msk.f32.mxu1 %vm1403_vm2, %v1404_v43 }
 0x29d   :  { %1262 = vmatpush3.xpose.msk.msra.mxu1 %vm579_vm1, %v1481_v2 }
 0x35a   :  { %v851_v1 = vpop.f32.mrb[12].mxu0 }
 0x35b   :  { %v1244_v0 = vpop.f32.mrb[13].mxu0  ;;  %1259 = vmatmul.mubr.msk.f32.vlgmr.msra.gmra.mrb[14].mxu0 %vm579_vm1, %v851_v1 }
 0x36a   :  { %v924_v3 = vpop.f32.mrb[12].mxu1 }
 0x36b   :  { %v1255_v4 = vpop.f32.mrb[13].mxu1  ;;  %1264 = vmatmul.mubr.msk.f32.vlgmr.msra.gmra.mrb[14].mxu1 %vm579_vm1, %v924_v3 }
 0x42e   :  { %v997_v5 = vpop.f32.mrb[14].mxu0 }
 0x42f   :  { %1074 = vst.msk [vmem:[#allocation8] sm:$0xff] %vm190_vm0, %v997_v5  ;;  %v1260_v6 = vpop.f32.mrb[15].mxu0 }
 0x43e   :  { %v1070_v7 = vpop.f32.mrb[14].mxu1 }
 0x43f   :  { %1075 = vst.msk [vmem:[#allocation8 + $0x8] sm:$0xff] %vm190_vm0, %v1070_v7  ;;  %v1265_v8 = vpop.f32.mrb[15].mxu1 }
 0x440   :  { %1380 = shalt.err (!%p1377_p0)
}
 0x441   :  { %s1381_s27 = scalar_lea.hbm %s1546_s3, 256 }
 0x442   :  { %p1382_p1 = scmp.ne.s32.totalorder %s1546_s3, %s1381_s27  ;;  %p1385_p2 = scmp.lt.u32.totalorder %s1381_s27, %s1546_s3 }
 0x444   :  { %p1387_p3 = pnand %p1385_p2, %p1382_p1 }
 0x446   :  { %1390 = shalt.err (!%p1387_p3)
}
 0x447   :  { %1087 = dma.vmem_to_hbm [thread:$0]  %s1082_s21, 256, %s1546_s3, [#allocation4], %s1399_s24, %s1399_s24, %s1400_s25  }
 0x448   :  { %1395 = dma.done.wait [#allocation4], 256  }
 0x449   :  { %1396 = vsyncadd [#allocation4], 4294967040 }
 0x44a   :  { %1091 = vsyncpa [#allocation3], 1 }
 0x44b   :  { %1092 = vsyncpa [#allocation6], 1 }
 0x44c   :  { %1093 = vsyncpa [#allocation4], 1 }

</bundles_post_ra>
